<compile_context>
chip_gen: v5e
topology: v5e:2x2
jax: 0.10.0
libtpu: 0.0.40
codegen_flags: <defaults>
</compile_context>

<pallas_src>
import math
import functools

import jax
import jax.numpy as jnp
from jax import lax
from jax.experimental import pallas as pl
from jax.experimental.pallas import tpu as pltpu


def _round_up(x, m):
    return (x + m - 1) // m * m


# -----------------------------------------------------------------------------
# Tiled dense projection: y = x @ Wt + b, Wt pre-transposed to (in, out).
# -----------------------------------------------------------------------------
def linear_kernel(x_ref, w_ref, b_ref, o_ref, acc_ref):
    @pl.when(pl.program_id(2) == 0)
    def _init():
        acc_ref[...] = jnp.zeros_like(acc_ref)

    acc_ref[...] += jnp.dot(x_ref[...], w_ref[...],
                            preferred_element_type=jnp.float32)

    @pl.when(pl.program_id(2) == pl.num_programs(2) - 1)
    def _finalize():
        o_ref[...] = (acc_ref[...] + b_ref[...]).astype(o_ref.dtype)


def pallas_linear(x, w_t, b, *, tm=256, tn=256, tk=512):
    """x: (M, K), w_t: (K, N) (pre-transposed), b: (N,) -> (M, N) float32."""
    M, K = x.shape
    Kw, N = w_t.shape
    assert K == Kw
    # Full-dim tiles when small (avoids padding); aligned tiles otherwise.
    tm = M if M <= tm else tm
    tn = N if N <= tn else tn
    tk = K if K <= tk else tk
    Mp, Np, Kp = _round_up(M, tm), _round_up(N, tn), _round_up(K, tk)
    if (Mp, Kp) != (M, K):
        x = jnp.pad(x, ((0, Mp - M), (0, Kp - K)))
    if (Kp, Np) != (K, N):
        w_t = jnp.pad(w_t, ((0, Kp - K), (0, Np - N)))
    if Np != N:
        b = jnp.pad(b, ((0, Np - N),))

    out = pl.pallas_call(
        linear_kernel,
        out_shape=jax.ShapeDtypeStruct((Mp, Np), jnp.float32),
        grid_spec=pltpu.PrefetchScalarGridSpec(
            num_scalar_prefetch=0,
            grid=(Mp // tm, Np // tn, Kp // tk),
            in_specs=[
                pl.BlockSpec((tm, tk), lambda i, j, k: (i, k)),
                pl.BlockSpec((tk, tn), lambda i, j, k: (k, j)),
                pl.BlockSpec((1, tn), lambda i, j, k: (0, j)),
            ],
            out_specs=pl.BlockSpec((tm, tn), lambda i, j, k: (i, j)),
            scratch_shapes=[pltpu.VMEM((tm, tn), jnp.float32)],
        ),
        compiler_params=pltpu.CompilerParams(
            dimension_semantics=("parallel", "parallel", "arbitrary")),
    )(x, w_t, b.reshape(1, Np))

    if (Mp, Np) != (M, N):
        out = out[:M, :N]
    return out


# -----------------------------------------------------------------------------
# Attention + fused output projection.
# One batch element (ALL heads) per grid step, directly on the (B, L, E)
# projection layout; WO is applied per-head and accumulated in registers so the
# merged attention output never touches HBM.
# Note: the softmax scale is already folded into Q (via WQ/bQ at prepare time).
# -----------------------------------------------------------------------------
def attn_kernel(q_ref, k_ref, v_ref, wo_ref, bo_ref, o_ref, p_ref,
                *, num_heads, head_dim):
    L = q_ref.shape[1]
    E = wo_ref.shape[1]
    acc = jnp.zeros((L, E), jnp.float32)   # fused WO output accumulator

    for h in range(num_heads):
        lo = h * head_dim
        hi = lo + head_dim
        qh = q_ref[0, :, lo:hi]                  # (L, D) — already scaled
        kh = k_ref[0, :, lo:hi]                  # (L, D)
        vh = v_ref[0, :, lo:hi]                  # (L, D)

        # Q @ K^T without materializing a transpose: contract last dims.
        s = lax.dot_general(qh, kh, (((1,), (1,)), ((), ())),
                            preferred_element_type=jnp.float32)   # (L, L)

        # Numerically-stable softmax over the key axis.
        m = jnp.max(s, axis=-1, keepdims=True)
        e = jnp.exp(s - m)
        d = jnp.sum(e, axis=-1, keepdims=True)                    # (L, 1)
        inv = pl.reciprocal(d, approx=True)                       # EUP slot
        inv = inv * (2.0 - d * inv)                               # Newton -> f32 accurate
        probs = e * inv                                           # (L, L)

        p_ref[0, h] = probs.astype(p_ref.dtype)

        head_out = jnp.dot(probs, vh,
                           preferred_element_type=jnp.float32)    # (L, D)
        # Fused output projection: this head's rows of WO_t.
        acc = acc + jnp.dot(head_out, wo_ref[lo:hi, :],
                            preferred_element_type=jnp.float32)   # (L, E)

    # One lane-dense store of the final projected output per batch element.
    o_ref[0] = (acc + bo_ref[...]).astype(o_ref.dtype)


def pallas_attention(Q, K, V, wo_t, bo, num_heads, head_dim):
    """Q/K/V: (B, L, E); wo_t: (E, E) pre-transposed; bo: (E,).
    Returns (final output (B, L, E), attn_probs (B, H, L, L))."""
    B, L, E = Q.shape
    kernel = functools.partial(attn_kernel, num_heads=num_heads, head_dim=head_dim)
    return pl.pallas_call(
        kernel,
        out_shape=(
            jax.ShapeDtypeStruct((B, L, E), jnp.float32),
            jax.ShapeDtypeStruct((B, num_heads, L, L), jnp.float32),
        ),
        grid_spec=pltpu.PrefetchScalarGridSpec(
            num_scalar_prefetch=0,
            grid=(B,),
            in_specs=[
                pl.BlockSpec((1, L, E), lambda b: (b, 0, 0)),
                pl.BlockSpec((1, L, E), lambda b: (b, 0, 0)),
                pl.BlockSpec((1, L, E), lambda b: (b, 0, 0)),
                pl.BlockSpec((E, E), lambda b: (0, 0)),   # WO_t, resident across steps
                pl.BlockSpec((1, E), lambda b: (0, 0)),   # b_O
            ],
            out_specs=[
                pl.BlockSpec((1, L, E), lambda b: (b, 0, 0)),
                pl.BlockSpec((1, num_heads, L, L), lambda b: (b, 0, 0, 0)),
            ],
        ),
        compiler_params=pltpu.CompilerParams(
            dimension_semantics=("parallel",)),
    )(Q, K, V, wo_t, bo.reshape(1, E))


# -----------------------------------------------------------------------------
# Full module forward.
# -----------------------------------------------------------------------------
@functools.partial(jax.jit, static_argnames=("num_heads",))
def multi_head_attention_forward(prepared_params, q, k, v, num_heads):
    B, q_len, E = q.shape
    k_len = k.shape[1]
    v_len = v.shape[1]
    assert q_len == k_len, "Query and Key lengths must be equal for self-attention"
    assert v_len == k_len, "Value length must match Key length"
    head_dim = E // num_heads

    p = prepared_params
    # Q projection already carries the 1/sqrt(head_dim) scale (folded into WQ/bQ).
    Q = pallas_linear(q.reshape(B * q_len, E), p["WQ_wt"], p["WQ_b"]).reshape(B, q_len, E)
    K = pallas_linear(k.reshape(B * k_len, E), p["WK_wt"], p["WK_b"]).reshape(B, k_len, E)
    V = pallas_linear(v.reshape(B * v_len, E), p["WV_wt"], p["WV_b"]).reshape(B, v_len, E)

    # Attention + fused WO projection: no split_heads transposes, and the merged
    # attention output never round-trips through HBM.
    out, attn_probs = pallas_attention(Q, K, V, p["WO_wt"], p["WO_b"],
                                       num_heads, head_dim)
    return out, attn_probs


def init_params(key, embed_dim):
    """nn.Linear-style init, PyTorch convention: W is (out_features, in_features)."""
    bound = 1.0 / math.sqrt(embed_dim)
    keys = jax.random.split(key, 8)
    names = ["WQ", "WK", "WV", "WO"]
    params = {}
    for i, n in enumerate(names):
        params[f"{n}_w"] = jax.random.uniform(
            keys[2 * i], (embed_dim, embed_dim), jnp.float32, -bound, bound)
        params[f"{n}_b"] = jax.random.uniform(
            keys[2 * i + 1], (embed_dim,), jnp.float32, -bound, bound)
    return params


def prepare_params(params, num_heads, embed_dim):
    """One-time transform: transpose weights to (in, out) so kernels never
    transpose W, and fold the softmax scale 1/sqrt(head_dim) into WQ / bQ."""
    head_dim = embed_dim // num_heads
    scale = 1.0 / math.sqrt(head_dim)
    out = {}
    for n in ["WQ", "WK", "WV", "WO"]:
        w = jnp.asarray(params[f"{n}_w"])
        b = jnp.asarray(params[f"{n}_b"])
        if n == "WQ":
            w = w * scale
            b = b * scale
        out[f"{n}_wt"] = w.T
        out[f"{n}_b"] = b
    return out


if __name__ == "__main__":
    # Small, module-consistent shapes: batch=2, seq=8, embed_dim=32, heads=4.
    B, L, E, H = 2, 8, 32, 4

    key = jax.random.PRNGKey(0)
    k_params, k_q, k_k, k_v = jax.random.split(key, 4)

    params = init_params(k_params, E)
    prepared = prepare_params(params, num_heads=H, embed_dim=E)
    q = jax.random.normal(k_q, (B, L, E), jnp.float32)
    k = jax.random.normal(k_k, (B, L, E), jnp.float32)
    v = jax.random.normal(k_v, (B, L, E), jnp.float32)

    out, attn_scores = multi_head_attention_forward(prepared, q, k, v, num_heads=H)
    out = jax.block_until_ready(out)
    attn_scores = jax.block_until_ready(attn_scores)

    # Plain-JAX reference (mirrors the PyTorch forward).
    def ref_forward(params, q, k, v):
        def lin(x, w, b):
            return x @ w.T + b
        head_dim = E // H
        Q = lin(q, params["WQ_w"], params["WQ_b"]).reshape(B, L, H, head_dim).transpose(0, 2, 1, 3)
        K = lin(k, params["WK_w"], params["WK_b"]).reshape(B, L, H, head_dim).transpose(0, 2, 1, 3)
        V = lin(v, params["WV_w"], params["WV_b"]).reshape(B, L, H, head_dim).transpose(0, 2, 1, 3)
        s = jnp.einsum("bhqd,bhkd->bhqk", Q, K) / math.sqrt(head_dim)
        p = jax.nn.softmax(s, axis=-1)
        o = jnp.einsum("bhqk,bhkd->bhqd", p, V).transpose(0, 2, 1, 3).reshape(B, L, E)
        return lin(o, params["WO_w"], params["WO_b"]), p

    ref_out, ref_p = ref_forward(params, q, k, v)
    assert out.shape == (B, L, E)
    assert attn_scores.shape == (B, H, L, L)
    assert jnp.allclose(out, ref_out, atol=1e-3, rtol=1e-3)
    assert jnp.allclose(attn_scores, ref_p, atol=1e-3, rtol=1e-3)

    print("KERNEL_OK")
</pallas_src>

<mosaic_0001>
module attributes {stable_mosaic.version = 11 : i64} {
  func.func @linear_kernel(%arg0: i32, %arg1: i32, %arg2: i32, %arg3: memref<16x32xf32, #tpu.memory_space<vmem>>, %arg4: memref<32x32xf32, #tpu.memory_space<vmem>>, %arg5: memref<1x32xf32, #tpu.memory_space<vmem>>, %arg6: memref<16x32xf32, #tpu.memory_space<vmem>>, %arg7: memref<16x32xf32, #tpu.memory_space<vmem>>) attributes {dimension_semantics = [#tpu.dimension_semantics<parallel>, #tpu.dimension_semantics<parallel>, #tpu.dimension_semantics<arbitrary>], iteration_bounds = array<i64: 1, 1, 1>, scalar_prefetch = 0 : i64, scratch_operands = 1 : i64, tpu.core_type = #tpu.core_type<tc>, window_params = [{transform_indices = @transform_0, window_bounds = array<i64: 16, 32>}, {transform_indices = @transform_1, window_bounds = array<i64: 32, 32>}, {transform_indices = @transform_2, window_bounds = array<i64: 1, 32>}, {transform_indices = @transform_3, window_bounds = array<i64: 16, 32>}]} {
    %c0_i32 = arith.constant 0 : i32
    %0 = arith.cmpi eq, %arg2, %c0_i32 : i32
    %1 = arith.extui %0 : i1 to i32
    %c0_i32_0 = arith.constant 0 : i32
    %2 = arith.cmpi ne, %1, %c0_i32_0 : i32
    scf.if %2 {
      %cst_10 = arith.constant 0.000000e+00 : f32
      %12 = vector.broadcast %cst_10 : f32 to vector<16x32xf32>
      %c0_11 = arith.constant 0 : index
      %c0_12 = arith.constant 0 : index
      %13 = vector.load %arg7[%c0_11, %c0_12] : memref<16x32xf32, #tpu.memory_space<vmem>>, vector<16x32xf32>
      tpu.vector_store %arg7[%c0_11, %c0_12], %12 {strides = array<i32>} : memref<16x32xf32, #tpu.memory_space<vmem>>, vector<16x32xf32>,
    } else {
    }
    %c0 = arith.constant 0 : index
    %c0_1 = arith.constant 0 : index
    %3 = vector.load %arg7[%c0, %c0_1] : memref<16x32xf32, #tpu.memory_space<vmem>>, vector<16x32xf32>
    %c0_2 = arith.constant 0 : index
    %c0_3 = arith.constant 0 : index
    %4 = vector.load %arg3[%c0_2, %c0_3] : memref<16x32xf32, #tpu.memory_space<vmem>>, vector<16x32xf32>
    %c0_4 = arith.constant 0 : index
    %c0_5 = arith.constant 0 : index
    %5 = vector.load %arg4[%c0_4, %c0_5] : memref<32x32xf32, #tpu.memory_space<vmem>>, vector<32x32xf32>
    %cst = arith.constant dense<0.000000e+00> : vector<16x32xf32>
    %6 = tpu.matmul %4, %5, %cst {dimension_numbers = #tpu.dot_dimension_numbers<[1], [0], [0], [1], [0, 0, 1, 1], [], []>} : vector<16x32xf32>, vector<32x32xf32>, vector<16x32xf32> -> vector<16x32xf32>
    %7 = arith.addf %3, %6 : vector<16x32xf32>
    %c0_6 = arith.constant 0 : index
    %c0_7 = arith.constant 0 : index
    %8 = vector.load %arg7[%c0_6, %c0_7] : memref<16x32xf32, #tpu.memory_space<vmem>>, vector<16x32xf32>
    tpu.vector_store %arg7[%c0_6, %c0_7], %7 {strides = array<i32>} : memref<16x32xf32, #tpu.memory_space<vmem>>, vector<16x32xf32>,
    %c0_i32_8 = arith.constant 0 : i32
    %9 = arith.cmpi eq, %arg2, %c0_i32_8 : i32
    %10 = arith.extui %9 : i1 to i32
    %c0_i32_9 = arith.constant 0 : i32
    %11 = arith.cmpi ne, %10, %c0_i32_9 : i32
    scf.if %11 {
      %c0_10 = arith.constant 0 : index
      %c0_11 = arith.constant 0 : index
      %12 = vector.load %arg7[%c0_10, %c0_11] : memref<16x32xf32, #tpu.memory_space<vmem>>, vector<16x32xf32>
      %c0_12 = arith.constant 0 : index
      %c0_13 = arith.constant 0 : index
      %13 = vector.load %arg5[%c0_12, %c0_13] : memref<1x32xf32, #tpu.memory_space<vmem>>, vector<1x32xf32>
      %14 = vector.broadcast %13 : vector<1x32xf32> to vector<16x32xf32>
      %15 = arith.addf %12, %14 : vector<16x32xf32>
      %c0_14 = arith.constant 0 : index
      %c0_15 = arith.constant 0 : index
      %16 = vector.load %arg6[%c0_14, %c0_15] : memref<16x32xf32, #tpu.memory_space<vmem>>, vector<16x32xf32>
      tpu.vector_store %arg6[%c0_14, %c0_15], %15 {strides = array<i32>} : memref<16x32xf32, #tpu.memory_space<vmem>>, vector<16x32xf32>,
    } else {
    }
    return
  }
  func.func @transform_0(%arg0: i32, %arg1: i32, %arg2: i32) -> (i32, i32) {
    %c0_i32 = arith.constant 0 : i32
    return %arg0, %arg2 : i32, i32
  }
  func.func @transform_1(%arg0: i32, %arg1: i32, %arg2: i32) -> (i32, i32) {
    %c0_i32 = arith.constant 0 : i32
    return %arg2, %arg1 : i32, i32
  }
  func.func @transform_2(%arg0: i32, %arg1: i32, %arg2: i32) -> (i32, i32) {
    %c0_i32 = arith.constant 0 : i32
    %c0_i32_0 = arith.constant 0 : i32
    return %c0_i32, %arg1 : i32, i32
  }
  func.func @transform_3(%arg0: i32, %arg1: i32, %arg2: i32) -> (i32, i32) {
    %c0_i32 = arith.constant 0 : i32
    return %arg0, %arg1 : i32, i32
  }
}

module attributes {stable_mosaic.version = 11 : i64} {
  func.func @linear_kernel(%arg0: i32, %arg1: i32, %arg2: i32, %arg3: memref<16x32xf32, #tpu.memory_space<vmem>>, %arg4: memref<32x32xf32, #tpu.memory_space<vmem>>, %arg5: memref<1x32xf32, #tpu.memory_space<vmem>>, %arg6: memref<16x32xf32, #tpu.memory_space<vmem>>, %arg7: memref<16x32xf32, #tpu.memory_space<vmem>>) attributes {dimension_semantics = [#tpu.dimension_semantics<parallel>, #tpu.dimension_semantics<parallel>, #tpu.dimension_semantics<arbitrary>], iteration_bounds = array<i64: 1, 1, 1>, scalar_prefetch = 0 : i64, scratch_operands = 1 : i64, tpu.core_type = #tpu.core_type<tc>, window_params = [{transform_indices = @transform_0, window_bounds = array<i64: 16, 32>}, {transform_indices = @transform_1, window_bounds = array<i64: 32, 32>}, {transform_indices = @transform_2, window_bounds = array<i64: 1, 32>}, {transform_indices = @transform_3, window_bounds = array<i64: 16, 32>}]} {
    %c0_i32 = arith.constant 0 : i32
    %0 = arith.cmpi eq, %arg2, %c0_i32 : i32
    %1 = arith.extui %0 : i1 to i32
    %c0_i32_0 = arith.constant 0 : i32
    %2 = arith.cmpi ne, %1, %c0_i32_0 : i32
    scf.if %2 {
      %cst_10 = arith.constant 0.000000e+00 : f32
      %12 = vector.broadcast %cst_10 : f32 to vector<16x32xf32>
      %c0_11 = arith.constant 0 : index
      %c0_12 = arith.constant 0 : index
      %13 = vector.load %arg7[%c0_11, %c0_12] : memref<16x32xf32, #tpu.memory_space<vmem>>, vector<16x32xf32>
      tpu.vector_store %arg7[%c0_11, %c0_12], %12 {strides = array<i32>} : memref<16x32xf32, #tpu.memory_space<vmem>>, vector<16x32xf32>,
    } else {
    }
    %c0 = arith.constant 0 : index
    %c0_1 = arith.constant 0 : index
    %3 = vector.load %arg7[%c0, %c0_1] : memref<16x32xf32, #tpu.memory_space<vmem>>, vector<16x32xf32>
    %c0_2 = arith.constant 0 : index
    %c0_3 = arith.constant 0 : index
    %4 = vector.load %arg3[%c0_2, %c0_3] : memref<16x32xf32, #tpu.memory_space<vmem>>, vector<16x32xf32>
    %c0_4 = arith.constant 0 : index
    %c0_5 = arith.constant 0 : index
    %5 = vector.load %arg4[%c0_4, %c0_5] : memref<32x32xf32, #tpu.memory_space<vmem>>, vector<32x32xf32>
    %cst = arith.constant dense<0.000000e+00> : vector<16x32xf32>
    %6 = tpu.matmul %4, %5, %cst {dimension_numbers = #tpu.dot_dimension_numbers<[1], [0], [0], [1], [0, 0, 1, 1], [], []>} : vector<16x32xf32>, vector<32x32xf32>, vector<16x32xf32> -> vector<16x32xf32>
    %7 = arith.addf %3, %6 : vector<16x32xf32>
    %c0_6 = arith.constant 0 : index
    %c0_7 = arith.constant 0 : index
    %8 = vector.load %arg7[%c0_6, %c0_7] : memref<16x32xf32, #tpu.memory_space<vmem>>, vector<16x32xf32>
    tpu.vector_store %arg7[%c0_6, %c0_7], %7 {strides = array<i32>} : memref<16x32xf32, #tpu.memory_space<vmem>>, vector<16x32xf32>,
    %c0_i32_8 = arith.constant 0 : i32
    %9 = arith.cmpi eq, %arg2, %c0_i32_8 : i32
    %10 = arith.extui %9 : i1 to i32
    %c0_i32_9 = arith.constant 0 : i32
    %11 = arith.cmpi ne, %10, %c0_i32_9 : i32
    scf.if %11 {
      %c0_10 = arith.constant 0 : index
      %c0_11 = arith.constant 0 : index
      %12 = vector.load %arg7[%c0_10, %c0_11] : memref<16x32xf32, #tpu.memory_space<vmem>>, vector<16x32xf32>
      %c0_12 = arith.constant 0 : index
      %c0_13 = arith.constant 0 : index
      %13 = vector.load %arg5[%c0_12, %c0_13] : memref<1x32xf32, #tpu.memory_space<vmem>>, vector<1x32xf32>
      %14 = vector.broadcast %13 : vector<1x32xf32> to vector<16x32xf32>
      %15 = arith.addf %12, %14 : vector<16x32xf32>
      %c0_14 = arith.constant 0 : index
      %c0_15 = arith.constant 0 : index
      %16 = vector.load %arg6[%c0_14, %c0_15] : memref<16x32xf32, #tpu.memory_space<vmem>>, vector<16x32xf32>
      tpu.vector_store %arg6[%c0_14, %c0_15], %15 {strides = array<i32>} : memref<16x32xf32, #tpu.memory_space<vmem>>, vector<16x32xf32>,
    } else {
    }
    return
  }
  func.func @transform_0(%arg0: i32, %arg1: i32, %arg2: i32) -> (i32, i32) {
    %c0_i32 = arith.constant 0 : i32
    return %arg0, %arg2 : i32, i32
  }
  func.func @transform_1(%arg0: i32, %arg1: i32, %arg2: i32) -> (i32, i32) {
    %c0_i32 = arith.constant 0 : i32
    return %arg2, %arg1 : i32, i32
  }
  func.func @transform_2(%arg0: i32, %arg1: i32, %arg2: i32) -> (i32, i32) {
    %c0_i32 = arith.constant 0 : i32
    %c0_i32_0 = arith.constant 0 : i32
    return %c0_i32, %arg1 : i32, i32
  }
  func.func @transform_3(%arg0: i32, %arg1: i32, %arg2: i32) -> (i32, i32) {
    %c0_i32 = arith.constant 0 : i32
    return %arg0, %arg1 : i32, i32
  }
}

module attributes {stable_mosaic.version = 11 : i64} {
  func.func @linear_kernel(%arg0: i32, %arg1: i32, %arg2: i32, %arg3: memref<16x32xf32, #tpu.memory_space<vmem>>, %arg4: memref<32x32xf32, #tpu.memory_space<vmem>>, %arg5: memref<1x32xf32, #tpu.memory_space<vmem>>, %arg6: memref<16x32xf32, #tpu.memory_space<vmem>>, %arg7: memref<16x32xf32, #tpu.memory_space<vmem>>) attributes {dimension_semantics = [#tpu.dimension_semantics<parallel>, #tpu.dimension_semantics<parallel>, #tpu.dimension_semantics<arbitrary>], iteration_bounds = array<i64: 1, 1, 1>, scalar_prefetch = 0 : i64, scratch_operands = 1 : i64, tpu.core_type = #tpu.core_type<tc>, window_params = [{transform_indices = @transform_0, window_bounds = array<i64: 16, 32>}, {transform_indices = @transform_1, window_bounds = array<i64: 32, 32>}, {transform_indices = @transform_2, window_bounds = array<i64: 1, 32>}, {transform_indices = @transform_3, window_bounds = array<i64: 16, 32>}]} {
    %c0_i32 = arith.constant 0 : i32
    %0 = arith.cmpi eq, %arg2, %c0_i32 : i32
    %1 = arith.extui %0 : i1 to i32
    %c0_i32_0 = arith.constant 0 : i32
    %2 = arith.cmpi ne, %1, %c0_i32_0 : i32
    scf.if %2 {
      %cst_10 = arith.constant 0.000000e+00 : f32
      %12 = vector.broadcast %cst_10 : f32 to vector<16x32xf32>
      %c0_11 = arith.constant 0 : index
      %c0_12 = arith.constant 0 : index
      %13 = vector.load %arg7[%c0_11, %c0_12] : memref<16x32xf32, #tpu.memory_space<vmem>>, vector<16x32xf32>
      tpu.vector_store %arg7[%c0_11, %c0_12], %12 {strides = array<i32>} : memref<16x32xf32, #tpu.memory_space<vmem>>, vector<16x32xf32>,
    } else {
    }
    %c0 = arith.constant 0 : index
    %c0_1 = arith.constant 0 : index
    %3 = vector.load %arg7[%c0, %c0_1] : memref<16x32xf32, #tpu.memory_space<vmem>>, vector<16x32xf32>
    %c0_2 = arith.constant 0 : index
    %c0_3 = arith.constant 0 : index
    %4 = vector.load %arg3[%c0_2, %c0_3] : memref<16x32xf32, #tpu.memory_space<vmem>>, vector<16x32xf32>
    %c0_4 = arith.constant 0 : index
    %c0_5 = arith.constant 0 : index
    %5 = vector.load %arg4[%c0_4, %c0_5] : memref<32x32xf32, #tpu.memory_space<vmem>>, vector<32x32xf32>
    %cst = arith.constant dense<0.000000e+00> : vector<16x32xf32>
    %6 = tpu.matmul %4, %5, %cst {dimension_numbers = #tpu.dot_dimension_numbers<[1], [0], [0], [1], [0, 0, 1, 1], [], []>} : vector<16x32xf32>, vector<32x32xf32>, vector<16x32xf32> -> vector<16x32xf32>
    %7 = arith.addf %3, %6 : vector<16x32xf32>
    %c0_6 = arith.constant 0 : index
    %c0_7 = arith.constant 0 : index
    %8 = vector.load %arg7[%c0_6, %c0_7] : memref<16x32xf32, #tpu.memory_space<vmem>>, vector<16x32xf32>
    tpu.vector_store %arg7[%c0_6, %c0_7], %7 {strides = array<i32>} : memref<16x32xf32, #tpu.memory_space<vmem>>, vector<16x32xf32>,
    %c0_i32_8 = arith.constant 0 : i32
    %9 = arith.cmpi eq, %arg2, %c0_i32_8 : i32
    %10 = arith.extui %9 : i1 to i32
    %c0_i32_9 = arith.constant 0 : i32
    %11 = arith.cmpi ne, %10, %c0_i32_9 : i32
    scf.if %11 {
      %c0_10 = arith.constant 0 : index
      %c0_11 = arith.constant 0 : index
      %12 = vector.load %arg7[%c0_10, %c0_11] : memref<16x32xf32, #tpu.memory_space<vmem>>, vector<16x32xf32>
      %c0_12 = arith.constant 0 : index
      %c0_13 = arith.constant 0 : index
      %13 = vector.load %arg5[%c0_12, %c0_13] : memref<1x32xf32, #tpu.memory_space<vmem>>, vector<1x32xf32>
      %14 = vector.broadcast %13 : vector<1x32xf32> to vector<16x32xf32>
      %15 = arith.addf %12, %14 : vector<16x32xf32>
      %c0_14 = arith.constant 0 : index
      %c0_15 = arith.constant 0 : index
      %16 = vector.load %arg6[%c0_14, %c0_15] : memref<16x32xf32, #tpu.memory_space<vmem>>, vector<16x32xf32>
      tpu.vector_store %arg6[%c0_14, %c0_15], %15 {strides = array<i32>} : memref<16x32xf32, #tpu.memory_space<vmem>>, vector<16x32xf32>,
    } else {
    }
    return
  }
  func.func @transform_0(%arg0: i32, %arg1: i32, %arg2: i32) -> (i32, i32) {
    %c0_i32 = arith.constant 0 : i32
    return %arg0, %arg2 : i32, i32
  }
  func.func @transform_1(%arg0: i32, %arg1: i32, %arg2: i32) -> (i32, i32) {
    %c0_i32 = arith.constant 0 : i32
    return %arg2, %arg1 : i32, i32
  }
  func.func @transform_2(%arg0: i32, %arg1: i32, %arg2: i32) -> (i32, i32) {
    %c0_i32 = arith.constant 0 : i32
    %c0_i32_0 = arith.constant 0 : i32
    return %c0_i32, %arg1 : i32, i32
  }
  func.func @transform_3(%arg0: i32, %arg1: i32, %arg2: i32) -> (i32, i32) {
    %c0_i32 = arith.constant 0 : i32
    return %arg0, %arg1 : i32, i32
  }
}

module attributes {stable_mosaic.version = 11 : i64} {
  func.func @attn_kernel(%arg0: i32, %arg1: memref<1x8x32xf32, #tpu.memory_space<vmem>>, %arg2: memref<1x8x32xf32, #tpu.memory_space<vmem>>, %arg3: memref<1x8x32xf32, #tpu.memory_space<vmem>>, %arg4: memref<32x32xf32, #tpu.memory_space<vmem>>, %arg5: memref<1x32xf32, #tpu.memory_space<vmem>>, %arg6: memref<1x8x32xf32, #tpu.memory_space<vmem>>, %arg7: memref<1x4x8x8xf32, #tpu.memory_space<vmem>>) attributes {dimension_semantics = [#tpu.dimension_semantics<parallel>], iteration_bounds = array<i64: 2>, scalar_prefetch = 0 : i64, scratch_operands = 0 : i64, tpu.core_type = #tpu.core_type<tc>, window_params = [{transform_indices = @transform_0, window_bounds = array<i64: 1, 8, 32>}, {transform_indices = @transform_1, window_bounds = array<i64: 1, 8, 32>}, {transform_indices = @transform_2, window_bounds = array<i64: 1, 8, 32>}, {pipeline_mode = #tpu.pipeline_mode<synchronous>, transform_indices = @transform_3, window_bounds = array<i64: 32, 32>}, {pipeline_mode = #tpu.pipeline_mode<synchronous>, transform_indices = @transform_4, window_bounds = array<i64: 1, 32>}, {transform_indices = @transform_5, window_bounds = array<i64: 1, 8, 32>}, {transform_indices = @transform_6, window_bounds = array<i64: 1, 4, 8, 8>}]} {
    %cst = arith.constant 0.000000e+00 : f32
    %0 = vector.broadcast %cst : f32 to vector<8x32xf32>
    %c0 = arith.constant 0 : index
    %c0_0 = arith.constant 0 : index
    %c0_1 = arith.constant 0 : index
    %1 = vector.load %arg1[%c0, %c0_0, %c0_1] : memref<1x8x32xf32, #tpu.memory_space<vmem>>, vector<1x8x8xf32>
    %2 = vector.shape_cast %1 : vector<1x8x8xf32> to vector<8x8xf32>
    %c0_2 = arith.constant 0 : index
    %c0_3 = arith.constant 0 : index
    %c0_4 = arith.constant 0 : index
    %3 = vector.load %arg2[%c0_2, %c0_3, %c0_4] : memref<1x8x32xf32, #tpu.memory_space<vmem>>, vector<1x8x8xf32>
    %4 = vector.shape_cast %3 : vector<1x8x8xf32> to vector<8x8xf32>
    %c0_5 = arith.constant 0 : index
    %c0_6 = arith.constant 0 : index
    %c0_7 = arith.constant 0 : index
    %5 = vector.load %arg3[%c0_5, %c0_6, %c0_7] : memref<1x8x32xf32, #tpu.memory_space<vmem>>, vector<1x8x8xf32>
    %6 = vector.shape_cast %5 : vector<1x8x8xf32> to vector<8x8xf32>
    %cst_8 = arith.constant dense<0.000000e+00> : vector<8x8xf32>
    %7 = tpu.matmul %2, %4, %cst_8 {dimension_numbers = #tpu.dot_dimension_numbers<[1], [1], [0], [0], [0, 0, 1, 0], [], []>} : vector<8x8xf32>, vector<8x8xf32>, vector<8x8xf32> -> vector<8x8xf32>
    %cst_9 = arith.constant dense<0xFF800000> : vector<8xf32>
    %8 = vector.multi_reduction <maximumf>, %7, %cst_9 [1] : vector<8x8xf32> to vector<8xf32>
    %9 = vector.shape_cast %8 : vector<8xf32> to vector<8x1xf32>
    %10 = vector.broadcast %9 : vector<8x1xf32> to vector<8x8xf32>
    %11 = arith.subf %7, %10 : vector<8x8xf32>
    %12 = math.exp %11 : vector<8x8xf32>
    %cst_10 = arith.constant dense<0.000000e+00> : vector<8xf32>
    %13 = vector.multi_reduction <add>, %12, %cst_10 [1] : vector<8x8xf32> to vector<8xf32>
    %14 = vector.shape_cast %13 : vector<8xf32> to vector<8x1xf32>
    %15 = tpu.reciprocal %14 {approx = true} : vector<8x1xf32> -> vector<8x1xf32>
    %16 = arith.mulf %14, %15 : vector<8x1xf32>
    %cst_11 = arith.constant 2.000000e+00 : f32
    %17 = vector.broadcast %cst_11 : f32 to vector<8x1xf32>
    %18 = arith.subf %17, %16 : vector<8x1xf32>
    %19 = arith.mulf %15, %18 : vector<8x1xf32>
    %20 = vector.broadcast %19 : vector<8x1xf32> to vector<8x8xf32>
    %21 = arith.mulf %12, %20 : vector<8x8xf32>
    %c0_12 = arith.constant 0 : index
    %c0_13 = arith.constant 0 : index
    %c0_14 = arith.constant 0 : index
    %c0_15 = arith.constant 0 : index
    %22 = vector.load %arg7[%c0_12, %c0_13, %c0_14, %c0_15] : memref<1x4x8x8xf32, #tpu.memory_space<vmem>>, vector<1x1x8x8xf32>
    %23 = vector.shape_cast %22 : vector<1x1x8x8xf32> to vector<8x8xf32>
    %24 = vector.shape_cast %21 : vector<8x8xf32> to vector<1x1x8x8xf32>
    tpu.vector_store %arg7[%c0_12, %c0_13, %c0_14, %c0_15], %24 {strides = array<i32>} : memref<1x4x8x8xf32, #tpu.memory_space<vmem>>, vector<1x1x8x8xf32>,
    %cst_16 = arith.constant dense<0.000000e+00> : vector<8x8xf32>
    %25 = tpu.matmul %21, %6, %cst_16 {dimension_numbers = #tpu.dot_dimension_numbers<[1], [0], [0], [1], [0, 0, 1, 1], [], []>} : vector<8x8xf32>, vector<8x8xf32>, vector<8x8xf32> -> vector<8x8xf32>
    %c0_17 = arith.constant 0 : index
    %c0_18 = arith.constant 0 : index
    %26 = vector.load %arg4[%c0_17, %c0_18] : memref<32x32xf32, #tpu.memory_space<vmem>>, vector<8x32xf32>
    %cst_19 = arith.constant dense<0.000000e+00> : vector<8x32xf32>
    %27 = tpu.matmul %25, %26, %cst_19 {dimension_numbers = #tpu.dot_dimension_numbers<[1], [0], [0], [1], [0, 0, 1, 1], [], []>} : vector<8x8xf32>, vector<8x32xf32>, vector<8x32xf32> -> vector<8x32xf32>
    %28 = arith.addf %0, %27 : vector<8x32xf32>
    %c0_20 = arith.constant 0 : index
    %c0_21 = arith.constant 0 : index
    %c8 = arith.constant 8 : index
    %29 = vector.load %arg1[%c0_20, %c0_21, %c8] : memref<1x8x32xf32, #tpu.memory_space<vmem>>, vector<1x8x8xf32>
    %30 = vector.shape_cast %29 : vector<1x8x8xf32> to vector<8x8xf32>
    %c0_22 = arith.constant 0 : index
    %c0_23 = arith.constant 0 : index
    %c8_24 = arith.constant 8 : index
    %31 = vector.load %arg2[%c0_22, %c0_23, %c8_24] : memref<1x8x32xf32, #tpu.memory_space<vmem>>, vector<1x8x8xf32>
    %32 = vector.shape_cast %31 : vector<1x8x8xf32> to vector<8x8xf32>
    %c0_25 = arith.constant 0 : index
    %c0_26 = arith.constant 0 : index
    %c8_27 = arith.constant 8 : index
    %33 = vector.load %arg3[%c0_25, %c0_26, %c8_27] : memref<1x8x32xf32, #tpu.memory_space<vmem>>, vector<1x8x8xf32>
    %34 = vector.shape_cast %33 : vector<1x8x8xf32> to vector<8x8xf32>
    %cst_28 = arith.constant dense<0.000000e+00> : vector<8x8xf32>
    %35 = tpu.matmul %30, %32, %cst_28 {dimension_numbers = #tpu.dot_dimension_numbers<[1], [1], [0], [0], [0, 0, 1, 0], [], []>} : vector<8x8xf32>, vector<8x8xf32>, vector<8x8xf32> -> vector<8x8xf32>
    %cst_29 = arith.constant dense<0xFF800000> : vector<8xf32>
    %36 = vector.multi_reduction <maximumf>, %35, %cst_29 [1] : vector<8x8xf32> to vector<8xf32>
    %37 = vector.shape_cast %36 : vector<8xf32> to vector<8x1xf32>
    %38 = vector.broadcast %37 : vector<8x1xf32> to vector<8x8xf32>
    %39 = arith.subf %35, %38 : vector<8x8xf32>
    %40 = math.exp %39 : vector<8x8xf32>
    %cst_30 = arith.constant dense<0.000000e+00> : vector<8xf32>
    %41 = vector.multi_reduction <add>, %40, %cst_30 [1] : vector<8x8xf32> to vector<8xf32>
    %42 = vector.shape_cast %41 : vector<8xf32> to vector<8x1xf32>
    %43 = tpu.reciprocal %42 {approx = true} : vector<8x1xf32> -> vector<8x1xf32>
    %44 = arith.mulf %42, %43 : vector<8x1xf32>
    %cst_31 = arith.constant 2.000000e+00 : f32
    %45 = vector.broadcast %cst_31 : f32 to vector<8x1xf32>
    %46 = arith.subf %45, %44 : vector<8x1xf32>
    %47 = arith.mulf %43, %46 : vector<8x1xf32>
    %48 = vector.broadcast %47 : vector<8x1xf32> to vector<8x8xf32>
    %49 = arith.mulf %40, %48 : vector<8x8xf32>
    %c0_32 = arith.constant 0 : index
    %c1 = arith.constant 1 : index
    %c0_33 = arith.constant 0 : index
    %c0_34 = arith.constant 0 : index
    %50 = vector.load %arg7[%c0_32, %c1, %c0_33, %c0_34] : memref<1x4x8x8xf32, #tpu.memory_space<vmem>>, vector<1x1x8x8xf32>
    %51 = vector.shape_cast %50 : vector<1x1x8x8xf32> to vector<8x8xf32>
    %52 = vector.shape_cast %49 : vector<8x8xf32> to vector<1x1x8x8xf32>
    tpu.vector_store %arg7[%c0_32, %c1, %c0_33, %c0_34], %52 {strides = array<i32>} : memref<1x4x8x8xf32, #tpu.memory_space<vmem>>, vector<1x1x8x8xf32>,
    %cst_35 = arith.constant dense<0.000000e+00> : vector<8x8xf32>
    %53 = tpu.matmul %49, %34, %cst_35 {dimension_numbers = #tpu.dot_dimension_numbers<[1], [0], [0], [1], [0, 0, 1, 1], [], []>} : vector<8x8xf32>, vector<8x8xf32>, vector<8x8xf32> -> vector<8x8xf32>
    %c8_36 = arith.constant 8 : index
    %c0_37 = arith.constant 0 : index
    %54 = vector.load %arg4[%c8_36, %c0_37] : memref<32x32xf32, #tpu.memory_space<vmem>>, vector<8x32xf32>
    %cst_38 = arith.constant dense<0.000000e+00> : vector<8x32xf32>
    %55 = tpu.matmul %53, %54, %cst_38 {dimension_numbers = #tpu.dot_dimension_numbers<[1], [0], [0], [1], [0, 0, 1, 1], [], []>} : vector<8x8xf32>, vector<8x32xf32>, vector<8x32xf32> -> vector<8x32xf32>
    %56 = arith.addf %28, %55 : vector<8x32xf32>
    %c0_39 = arith.constant 0 : index
    %c0_40 = arith.constant 0 : index
    %c16 = arith.constant 16 : index
    %57 = vector.load %arg1[%c0_39, %c0_40, %c16] : memref<1x8x32xf32, #tpu.memory_space<vmem>>, vector<1x8x8xf32>
    %58 = vector.shape_cast %57 : vector<1x8x8xf32> to vector<8x8xf32>
    %c0_41 = arith.constant 0 : index
    %c0_42 = arith.constant 0 : index
    %c16_43 = arith.constant 16 : index
    %59 = vector.load %arg2[%c0_41, %c0_42, %c16_43] : memref<1x8x32xf32, #tpu.memory_space<vmem>>, vector<1x8x8xf32>
    %60 = vector.shape_cast %59 : vector<1x8x8xf32> to vector<8x8xf32>
    %c0_44 = arith.constant 0 : index
    %c0_45 = arith.constant 0 : index
    %c16_46 = arith.constant 16 : index
    %61 = vector.load %arg3[%c0_44, %c0_45, %c16_46] : memref<1x8x32xf32, #tpu.memory_space<vmem>>, vector<1x8x8xf32>
    %62 = vector.shape_cast %61 : vector<1x8x8xf32> to vector<8x8xf32>
    %cst_47 = arith.constant dense<0.000000e+00> : vector<8x8xf32>
    %63 = tpu.matmul %58, %60, %cst_47 {dimension_numbers = #tpu.dot_dimension_numbers<[1], [1], [0], [0], [0, 0, 1, 0], [], []>} : vector<8x8xf32>, vector<8x8xf32>, vector<8x8xf32> -> vector<8x8xf32>
    %cst_48 = arith.constant dense<0xFF800000> : vector<8xf32>
    %64 = vector.multi_reduction <maximumf>, %63, %cst_48 [1] : vector<8x8xf32> to vector<8xf32>
    %65 = vector.shape_cast %64 : vector<8xf32> to vector<8x1xf32>
    %66 = vector.broadcast %65 : vector<8x1xf32> to vector<8x8xf32>
    %67 = arith.subf %63, %66 : vector<8x8xf32>
    %68 = math.exp %67 : vector<8x8xf32>
    %cst_49 = arith.constant dense<0.000000e+00> : vector<8xf32>
    %69 = vector.multi_reduction <add>, %68, %cst_49 [1] : vector<8x8xf32> to vector<8xf32>
    %70 = vector.shape_cast %69 : vector<8xf32> to vector<8x1xf32>
    %71 = tpu.reciprocal %70 {approx = true} : vector<8x1xf32> -> vector<8x1xf32>
    %72 = arith.mulf %70, %71 : vector<8x1xf32>
    %cst_50 = arith.constant 2.000000e+00 : f32
    %73 = vector.broadcast %cst_50 : f32 to vector<8x1xf32>
    %74 = arith.subf %73, %72 : vector<8x1xf32>
    %75 = arith.mulf %71, %74 : vector<8x1xf32>
    %76 = vector.broadcast %75 : vector<8x1xf32> to vector<8x8xf32>
    %77 = arith.mulf %68, %76 : vector<8x8xf32>
    %c0_51 = arith.constant 0 : index
    %c2 = arith.constant 2 : index
    %c0_52 = arith.constant 0 : index
    %c0_53 = arith.constant 0 : index
    %78 = vector.load %arg7[%c0_51, %c2, %c0_52, %c0_53] : memref<1x4x8x8xf32, #tpu.memory_space<vmem>>, vector<1x1x8x8xf32>
    %79 = vector.shape_cast %78 : vector<1x1x8x8xf32> to vector<8x8xf32>
    %80 = vector.shape_cast %77 : vector<8x8xf32> to vector<1x1x8x8xf32>
    tpu.vector_store %arg7[%c0_51, %c2, %c0_52, %c0_53], %80 {strides = array<i32>} : memref<1x4x8x8xf32, #tpu.memory_space<vmem>>, vector<1x1x8x8xf32>,
    %cst_54 = arith.constant dense<0.000000e+00> : vector<8x8xf32>
    %81 = tpu.matmul %77, %62, %cst_54 {dimension_numbers = #tpu.dot_dimension_numbers<[1], [0], [0], [1], [0, 0, 1, 1], [], []>} : vector<8x8xf32>, vector<8x8xf32>, vector<8x8xf32> -> vector<8x8xf32>
    %c16_55 = arith.constant 16 : index
    %c0_56 = arith.constant 0 : index
    %82 = vector.load %arg4[%c16_55, %c0_56] : memref<32x32xf32, #tpu.memory_space<vmem>>, vector<8x32xf32>
    %cst_57 = arith.constant dense<0.000000e+00> : vector<8x32xf32>
    %83 = tpu.matmul %81, %82, %cst_57 {dimension_numbers = #tpu.dot_dimension_numbers<[1], [0], [0], [1], [0, 0, 1, 1], [], []>} : vector<8x8xf32>, vector<8x32xf32>, vector<8x32xf32> -> vector<8x32xf32>
    %84 = arith.addf %56, %83 : vector<8x32xf32>
    %c0_58 = arith.constant 0 : index
    %c0_59 = arith.constant 0 : index
    %c24 = arith.constant 24 : index
    %85 = vector.load %arg1[%c0_58, %c0_59, %c24] : memref<1x8x32xf32, #tpu.memory_space<vmem>>, vector<1x8x8xf32>
    %86 = vector.shape_cast %85 : vector<1x8x8xf32> to vector<8x8xf32>
    %c0_60 = arith.constant 0 : index
    %c0_61 = arith.constant 0 : index
    %c24_62 = arith.constant 24 : index
    %87 = vector.load %arg2[%c0_60, %c0_61, %c24_62] : memref<1x8x32xf32, #tpu.memory_space<vmem>>, vector<1x8x8xf32>
    %88 = vector.shape_cast %87 : vector<1x8x8xf32> to vector<8x8xf32>
    %c0_63 = arith.constant 0 : index
    %c0_64 = arith.constant 0 : index
    %c24_65 = arith.constant 24 : index
    %89 = vector.load %arg3[%c0_63, %c0_64, %c24_65] : memref<1x8x32xf32, #tpu.memory_space<vmem>>, vector<1x8x8xf32>
    %90 = vector.shape_cast %89 : vector<1x8x8xf32> to vector<8x8xf32>
    %cst_66 = arith.constant dense<0.000000e+00> : vector<8x8xf32>
    %91 = tpu.matmul %86, %88, %cst_66 {dimension_numbers = #tpu.dot_dimension_numbers<[1], [1], [0], [0], [0, 0, 1, 0], [], []>} : vector<8x8xf32>, vector<8x8xf32>, vector<8x8xf32> -> vector<8x8xf32>
    %cst_67 = arith.constant dense<0xFF800000> : vector<8xf32>
    %92 = vector.multi_reduction <maximumf>, %91, %cst_67 [1] : vector<8x8xf32> to vector<8xf32>
    %93 = vector.shape_cast %92 : vector<8xf32> to vector<8x1xf32>
    %94 = vector.broadcast %93 : vector<8x1xf32> to vector<8x8xf32>
    %95 = arith.subf %91, %94 : vector<8x8xf32>
    %96 = math.exp %95 : vector<8x8xf32>
    %cst_68 = arith.constant dense<0.000000e+00> : vector<8xf32>
    %97 = vector.multi_reduction <add>, %96, %cst_68 [1] : vector<8x8xf32> to vector<8xf32>
    %98 = vector.shape_cast %97 : vector<8xf32> to vector<8x1xf32>
    %99 = tpu.reciprocal %98 {approx = true} : vector<8x1xf32> -> vector<8x1xf32>
    %100 = arith.mulf %98, %99 : vector<8x1xf32>
    %cst_69 = arith.constant 2.000000e+00 : f32
    %101 = vector.broadcast %cst_69 : f32 to vector<8x1xf32>
    %102 = arith.subf %101, %100 : vector<8x1xf32>
    %103 = arith.mulf %99, %102 : vector<8x1xf32>
    %104 = vector.broadcast %103 : vector<8x1xf32> to vector<8x8xf32>
    %105 = arith.mulf %96, %104 : vector<8x8xf32>
    %c0_70 = arith.constant 0 : index
    %c3 = arith.constant 3 : index
    %c0_71 = arith.constant 0 : index
    %c0_72 = arith.constant 0 : index
    %106 = vector.load %arg7[%c0_70, %c3, %c0_71, %c0_72] : memref<1x4x8x8xf32, #tpu.memory_space<vmem>>, vector<1x1x8x8xf32>
    %107 = vector.shape_cast %106 : vector<1x1x8x8xf32> to vector<8x8xf32>
    %108 = vector.shape_cast %105 : vector<8x8xf32> to vector<1x1x8x8xf32>
    tpu.vector_store %arg7[%c0_70, %c3, %c0_71, %c0_72], %108 {strides = array<i32>} : memref<1x4x8x8xf32, #tpu.memory_space<vmem>>, vector<1x1x8x8xf32>,
    %cst_73 = arith.constant dense<0.000000e+00> : vector<8x8xf32>
    %109 = tpu.matmul %105, %90, %cst_73 {dimension_numbers = #tpu.dot_dimension_numbers<[1], [0], [0], [1], [0, 0, 1, 1], [], []>} : vector<8x8xf32>, vector<8x8xf32>, vector<8x8xf32> -> vector<8x8xf32>
    %c24_74 = arith.constant 24 : index
    %c0_75 = arith.constant 0 : index
    %110 = vector.load %arg4[%c24_74, %c0_75] : memref<32x32xf32, #tpu.memory_space<vmem>>, vector<8x32xf32>
    %cst_76 = arith.constant dense<0.000000e+00> : vector<8x32xf32>
    %111 = tpu.matmul %109, %110, %cst_76 {dimension_numbers = #tpu.dot_dimension_numbers<[1], [0], [0], [1], [0, 0, 1, 1], [], []>} : vector<8x8xf32>, vector<8x32xf32>, vector<8x32xf32> -> vector<8x32xf32>
    %112 = arith.addf %84, %111 : vector<8x32xf32>
    %c0_77 = arith.constant 0 : index
    %c0_78 = arith.constant 0 : index
    %113 = vector.load %arg5[%c0_77, %c0_78] : memref<1x32xf32, #tpu.memory_space<vmem>>, vector<1x32xf32>
    %114 = vector.broadcast %113 : vector<1x32xf32> to vector<8x32xf32>
    %115 = arith.addf %112, %114 : vector<8x32xf32>
    %c0_79 = arith.constant 0 : index
    %c0_80 = arith.constant 0 : index
    %c0_81 = arith.constant 0 : index
    %116 = vector.load %arg6[%c0_79, %c0_80, %c0_81] : memref<1x8x32xf32, #tpu.memory_space<vmem>>, vector<1x8x32xf32>
    %117 = vector.shape_cast %116 : vector<1x8x32xf32> to vector<8x32xf32>
    %118 = vector.shape_cast %115 : vector<8x32xf32> to vector<1x8x32xf32>
    tpu.vector_store %arg6[%c0_79, %c0_80, %c0_81], %118 {strides = array<i32>} : memref<1x8x32xf32, #tpu.memory_space<vmem>>, vector<1x8x32xf32>,
    return
  }
  func.func @transform_0(%arg0: i32) -> (i32, i32, i32) {
    %c0_i32 = arith.constant 0 : i32
    %c0_i32_0 = arith.constant 0 : i32
    %c0_i32_1 = arith.constant 0 : i32
    return %arg0, %c0_i32, %c0_i32_0 : i32, i32, i32
  }
  func.func @transform_1(%arg0: i32) -> (i32, i32, i32) {
    %c0_i32 = arith.constant 0 : i32
    %c0_i32_0 = arith.constant 0 : i32
    %c0_i32_1 = arith.constant 0 : i32
    return %arg0, %c0_i32, %c0_i32_0 : i32, i32, i32
  }
  func.func @transform_2(%arg0: i32) -> (i32, i32, i32) {
    %c0_i32 = arith.constant 0 : i32
    %c0_i32_0 = arith.constant 0 : i32
    %c0_i32_1 = arith.constant 0 : i32
    return %arg0, %c0_i32, %c0_i32_0 : i32, i32, i32
  }
  func.func @transform_3(%arg0: i32) -> (i32, i32) {
    %c0_i32 = arith.constant 0 : i32
    %c0_i32_0 = arith.constant 0 : i32
    %c0_i32_1 = arith.constant 0 : i32
    return %c0_i32, %c0_i32_0 : i32, i32
  }
  func.func @transform_4(%arg0: i32) -> (i32, i32) {
    %c0_i32 = arith.constant 0 : i32
    %c0_i32_0 = arith.constant 0 : i32
    %c0_i32_1 = arith.constant 0 : i32
    return %c0_i32, %c0_i32_0 : i32, i32
  }
  func.func @transform_5(%arg0: i32) -> (i32, i32, i32) {
    %c0_i32 = arith.constant 0 : i32
    %c0_i32_0 = arith.constant 0 : i32
    %c0_i32_1 = arith.constant 0 : i32
    return %arg0, %c0_i32, %c0_i32_0 : i32, i32, i32
  }
  func.func @transform_6(%arg0: i32) -> (i32, i32, i32, i32) {
    %c0_i32 = arith.constant 0 : i32
    %c0_i32_0 = arith.constant 0 : i32
    %c0_i32_1 = arith.constant 0 : i32
    %c0_i32_2 = arith.constant 0 : i32
    return %arg0, %c0_i32, %c0_i32_0, %c0_i32_1 : i32, i32, i32, i32
  }
}

</mosaic_0001>

<bundles_post_ra>
// kernel: multi_head_attention_forward.4
= control target key start
LH: loop header
LB: loop body
LE: loop exit
PB: predicated region body
PF: predicated region fallthrough
CT: control target
= control target key end

     0   :  { %8 = vsyncpa [#allocation4], 0  ;;  %s227_s0 = inlined_call_operand.vmem [shape: f32[16,32], index: 0, kind: input, shape index: {}]   ;;  %s228_s1 = inlined_call_operand.hbm [shape: f32[32,32], index: 1, kind: input, shape index: {}]   ;;  %s229_s2 = inlined_call_operand.hbm [shape: f32[1,32], index: 2, kind: input, shape index: {}]   ;;  %s230_s3 = inlined_call_operand.vmem [shape: f32[16,32], index: 3, kind: output, shape index: {}]  }
   0x1   :  { %s16_s14 = sshll.u32 %s228_s1, 4  ;;  %s17_s14 = int_to_ptr.hbm [resolvable:$true] %s16_s14 }
   0x2   :  { %9 = vsyncpa [#allocation6], 0  ;;  %s176_s15 = smov [#allocation3]   ;;  %s30_s19 = sshll.u32 %s229_s2, 4  ;;  %s31_s19 = int_to_ptr.hbm [resolvable:$true] %s30_s19 }
   0x3   :  { %s18_s16 = sshll.u32 %s176_s15, 4  ;;  %s177_s20 = smov 128   ;;  %s19_s16 = int_to_ptr.vmem [resolvable:$true] %s18_s16 }
   0x4   :  { %s178_s21 = smov 8   ;;  %s179_s22 = smov [#allocation5]  }
   0x5   :  { %24 = dma.hbm_to_vmem [thread:$0]  %s17_s14, 512, %s19_s16, [#allocation4], %s177_s20, %s177_s20, %s178_s21  }
   0x6   :  { %s32_s23 = sshll.u32 %s179_s22, 4  ;;  %s33_s23 = int_to_ptr.vmem [resolvable:$true] %s32_s23 }
   0x7   :  { %35 = dma.hbm_to_vmem [thread:$0]  %s31_s19, 16, %s33_s23, [#allocation6]  }
   0x8   :  { %172 = dma.done.wait [#allocation4], 512  }
   0x9   :  { %173 = vsyncadd [#allocation4], 4294966784 }
   0xa   :  { %174 = dma.done.wait [#allocation6], 16  }
   0xb   :  { %175 = vsyncadd [#allocation6], 4294967280  ;;  %vm48_vm0 = vcmask 261120   ;;  %v180_v0 = vmov 0.0   ;;  %v58_v1 = vld [vmem:[#allocation3 + $0x18] sm:$0xff]  ;;  %v57_v2 = vld [vmem:[#allocation3 + $0x10] sm:$0xff] }
   0xc   :  { %49 = vst.msk [vmem:[#allocation2] sm:$0xff] %vm48_vm0, %v180_v0  ;;  %78 = vmatpush.msra.mxu0 %v58_v1  ;;  %114 = vmatpush.msra.mxu1 %v58_v1  ;;  %v56_v3 = vld [vmem:[#allocation3 + $0x8] sm:$0xff]  ;;  %v55_v4 = vld [vmem:[#allocation3] sm:$0xff]  ;;  %v53_v5 = vld [vmem:[%s227_s0] sm:$0xff] }
   0xd   :  { %50 = vst.msk [vmem:[#allocation2 + $0x8] sm:$0xff] %vm48_vm0, %v180_v0  ;;  %v54_v6 = vld [vmem:[%s227_s0 + $0x8] sm:$0xff]  ;;  %v123_v13 = vld [vmem:[#allocation5] ss:$0 sm:$0xff] }
   0xe   :  { %79 = vmatpush.msra.mxu0 %v57_v2  ;;  %115 = vmatpush.msra.mxu1 %v57_v2 }
  0x10   :  { %80 = vmatpush.msra.mxu0 %v56_v3  ;;  %116 = vmatpush.msra.mxu1 %v56_v3 }
  0x12   :  { %81 = vmatpush.msra.mxu0 %v55_v4  ;;  %117 = vmatpush.msra.mxu1 %v55_v4 }
  0x13   :  { %112 = vmatmul.msk.f32.vlgmr.msra.gmra.mxu0 %vm48_vm0, %v53_v5  ;;  %113 = vmatmul.msk.f32.vlgmr.msra.gmra.mxu1 %vm48_vm0, %v54_v6  ;;  %v51_v7 = vld [vmem:[#allocation2] sm:$0xff] }
  0x14   :  { %v52_v8 = vld [vmem:[#allocation2 + $0x8] sm:$0xff] }
  0x90   :  { %v83_v9 = vpop.f32.mrf.mxu0  ;;  %v86_v10 = vpop.f32.mrf.mxu1 }
  0x91   :  { %v89_v11 = vadd.f32 %v83_v9, %v51_v7  ;;  %v90_v12 = vadd.f32 %v86_v10, %v52_v8 }
  0x93   :  { %91 = vst.msk [vmem:[#allocation2] sm:$0xff] %vm48_vm0, %v89_v11 }
  0x94   :  { %92 = vst.msk [vmem:[#allocation2 + $0x8] sm:$0xff] %vm48_vm0, %v90_v12 }
  0x9a   :  { %v96_v14 = vld [vmem:[#allocation2] sm:$0xff] }
  0x9b   :  { %v102_v15 = vadd.f32 %v123_v13, %v96_v14  ;;  %v97_v16 = vld [vmem:[#allocation2 + $0x8] sm:$0xff] }
  0x9c   :  { %v103_v17 = vadd.f32 %v123_v13, %v97_v16 }
  0x9d   :  { %104 = vst.msk [vmem:[%s230_s3] sm:$0xff] %vm48_vm0, %v102_v15 }
  0x9e   :  { %105 = vst.msk [vmem:[%s230_s3 + $0x8] sm:$0xff] %vm48_vm0, %v103_v17 }
  0x9f   :  { %110 = vsyncpa [#allocation4], 1 }
  0xa0   :  { %111 = vsyncpa [#allocation6], 1 }

// kernel: multi_head_attention_forward.6
= control target key start
LH: loop header
LB: loop body
LE: loop exit
PB: predicated region body
PF: predicated region fallthrough
CT: control target
= control target key end

     0   :  { %8 = vsyncpa [#allocation4], 0  ;;  %s226_s0 = inlined_call_operand.hbm [shape: f32[16,32], index: 0, kind: input, shape index: {}]   ;;  %s227_s1 = inlined_call_operand.hbm [shape: f32[32,32], index: 1, kind: input, shape index: {}]   ;;  %s228_s2 = inlined_call_operand.vmem [shape: f32[1,32], index: 2, kind: input, shape index: {}]   ;;  %s229_s3 = inlined_call_operand.vmem [shape: f32[16,32], index: 3, kind: output, shape index: {}]  }
   0x1   :  { %s14_s14 = sshll.u32 %s226_s0, 4  ;;  %s15_s14 = int_to_ptr.hbm [resolvable:$true] %s14_s14 }
   0x2   :  { %9 = vsyncpa [#allocation6], 0  ;;  %s178_s15 = smov [#allocation3]   ;;  %s27_s19 = sshll.u32 %s227_s1, 4  ;;  %s28_s19 = int_to_ptr.hbm [resolvable:$true] %s27_s19 }
   0x3   :  { %s16_s16 = sshll.u32 %s178_s15, 4  ;;  %s179_s20 = smov 128   ;;  %s17_s16 = int_to_ptr.vmem [resolvable:$true] %s16_s16 }
   0x4   :  { %s180_s21 = smov 8   ;;  %s181_s22 = smov [#allocation5]  }
   0x5   :  { %22 = dma.hbm_to_vmem [thread:$0]  %s15_s14, 256, %s17_s16, [#allocation4], %s179_s20, %s179_s20, %s180_s21  }
   0x6   :  { %s29_s23 = sshll.u32 %s181_s22, 4  ;;  %s30_s23 = int_to_ptr.vmem [resolvable:$true] %s29_s23 }
   0x7   :  { %35 = dma.hbm_to_vmem [thread:$0]  %s28_s19, 512, %s30_s23, [#allocation6], %s179_s20, %s179_s20, %s180_s21  }
   0x8   :  { %174 = dma.done.wait [#allocation4], 256  }
   0x9   :  { %175 = vsyncadd [#allocation4], 4294967040 }
   0xa   :  { %176 = dma.done.wait [#allocation6], 512  }
   0xb   :  { %177 = vsyncadd [#allocation6], 4294966784  ;;  %vm50_vm0 = vcmask 261120   ;;  %v182_v0 = vmov 0.0   ;;  %v60_v1 = vld [vmem:[#allocation5 + $0x18] sm:$0xff]  ;;  %v59_v2 = vld [vmem:[#allocation5 + $0x10] sm:$0xff] }
   0xc   :  { %51 = vst.msk [vmem:[#allocation2] sm:$0xff] %vm50_vm0, %v182_v0  ;;  %80 = vmatpush.msra.mxu0 %v60_v1  ;;  %116 = vmatpush.msra.mxu1 %v60_v1  ;;  %v58_v3 = vld [vmem:[#allocation5 + $0x8] sm:$0xff]  ;;  %v57_v4 = vld [vmem:[#allocation5] sm:$0xff]  ;;  %v55_v5 = vld [vmem:[#allocation3] sm:$0xff] }
   0xd   :  { %52 = vst.msk [vmem:[#allocation2 + $0x8] sm:$0xff] %vm50_vm0, %v182_v0  ;;  %v56_v6 = vld [vmem:[#allocation3 + $0x8] sm:$0xff]  ;;  %v125_v13 = vld [vmem:[%s228_s2] ss:$0 sm:$0xff] }
   0xe   :  { %81 = vmatpush.msra.mxu0 %v59_v2  ;;  %117 = vmatpush.msra.mxu1 %v59_v2 }
  0x10   :  { %82 = vmatpush.msra.mxu0 %v58_v3  ;;  %118 = vmatpush.msra.mxu1 %v58_v3 }
  0x12   :  { %83 = vmatpush.msra.mxu0 %v57_v4  ;;  %119 = vmatpush.msra.mxu1 %v57_v4 }
  0x13   :  { %114 = vmatmul.msk.f32.vlgmr.msra.gmra.mxu0 %vm50_vm0, %v55_v5  ;;  %115 = vmatmul.msk.f32.vlgmr.msra.gmra.mxu1 %vm50_vm0, %v56_v6  ;;  %v53_v7 = vld [vmem:[#allocation2] sm:$0xff] }
  0x14   :  { %v54_v8 = vld [vmem:[#allocation2 + $0x8] sm:$0xff] }
  0x90   :  { %v85_v9 = vpop.f32.mrf.mxu0  ;;  %v88_v10 = vpop.f32.mrf.mxu1 }
  0x91   :  { %v91_v11 = vadd.f32 %v85_v9, %v53_v7  ;;  %v92_v12 = vadd.f32 %v88_v10, %v54_v8 }
  0x93   :  { %93 = vst.msk [vmem:[#allocation2] sm:$0xff] %vm50_vm0, %v91_v11 }
  0x94   :  { %94 = vst.msk [vmem:[#allocation2 + $0x8] sm:$0xff] %vm50_vm0, %v92_v12 }
  0x9a   :  { %v98_v14 = vld [vmem:[#allocation2] sm:$0xff] }
  0x9b   :  { %v104_v15 = vadd.f32 %v125_v13, %v98_v14  ;;  %v99_v16 = vld [vmem:[#allocation2 + $0x8] sm:$0xff] }
  0x9c   :  { %v105_v17 = vadd.f32 %v125_v13, %v99_v16 }
  0x9d   :  { %106 = vst.msk [vmem:[%s229_s3] sm:$0xff] %vm50_vm0, %v104_v15 }
  0x9e   :  { %107 = vst.msk [vmem:[%s229_s3 + $0x8] sm:$0xff] %vm50_vm0, %v105_v17 }
  0x9f   :  { %112 = vsyncpa [#allocation4], 1 }
  0xa0   :  { %113 = vsyncpa [#allocation6], 1 }

// kernel: multi_head_attention_forward.5
= control target key start
LH: loop header
LB: loop body
LE: loop exit
PB: predicated region body
PF: predicated region fallthrough
CT: control target
= control target key end

     0   :  { %8 = vsyncpa [#allocation4], 0  ;;  %s265_s0 = inlined_call_operand.hbm [shape: f32[16,32], index: 0, kind: input, shape index: {}]   ;;  %s266_s1 = inlined_call_operand.hbm [shape: f32[32,32], index: 1, kind: input, shape index: {}]   ;;  %s267_s2 = inlined_call_operand.hbm [shape: f32[1,32], index: 2, kind: input, shape index: {}]   ;;  %s268_s3 = inlined_call_operand.vmem [shape: f32[16,32], index: 3, kind: output, shape index: {}]  }
   0x1   :  { %9 = vsyncpa [#allocation6], 0  ;;  %s27_s14 = sshll.u32 %s266_s1, 4  ;;  %s216_s15 = smov [#allocation5]   ;;  %s28_s14 = int_to_ptr.hbm [resolvable:$true] %s27_s14 }
   0x2   :  { %s29_s16 = sshll.u32 %s216_s15, 4  ;;  %s14_s19 = sshll.u32 %s265_s0, 4  ;;  %s30_s16 = int_to_ptr.vmem [resolvable:$true] %s29_s16  ;;  %s15_s19 = int_to_ptr.hbm [resolvable:$true] %s14_s19 }
   0x3   :  { %s217_s20 = smov 128   ;;  %s218_s21 = smov 8  }
   0x4   :  { %35 = dma.hbm_to_vmem [thread:$0]  %s28_s14, 512, %s30_s16, [#allocation6], %s217_s20, %s217_s20, %s218_s21  }
   0x5   :  { %s219_s22 = smov [#allocation3]   ;;  %s41_s26 = sshll.u32 %s267_s2, 4  ;;  %s42_s26 = int_to_ptr.hbm [resolvable:$true] %s41_s26 }
   0x6   :  { %s16_s23 = sshll.u32 %s219_s22, 4  ;;  %s220_s1 = smov [#allocation7]   ;;  %s17_s23 = int_to_ptr.vmem [resolvable:$true] %s16_s23 }
   0x7   :  { %22 = dma.hbm_to_vmem [thread:$0]  %s15_s19, 256, %s17_s23, [#allocation4], %s217_s20, %s217_s20, %s218_s21  }
   0x8   :  { %s43_s27 = sshll.u32 %s220_s1, 4  ;;  %s44_s27 = int_to_ptr.vmem [resolvable:$true] %s43_s27 }
   0x9   :  { %46 = dma.hbm_to_vmem [thread:$0]  %s42_s26, 16, %s44_s27, [#allocation6]  }
   0xa   :  { %212 = dma.done.wait [#allocation4], 256  }
   0xb   :  { %213 = vsyncadd [#allocation4], 4294967040 }
   0xc   :  { %214 = dma.done.wait [#allocation6], 528  }
   0xd   :  { %215 = vsyncadd [#allocation6], 4294966768  ;;  %vm63_vm0 = vcmask 261120   ;;  %v221_v0 = vmov 0.0   ;;  %v73_v1 = vld [vmem:[#allocation5 + $0x18] sm:$0xff]  ;;  %v72_v2 = vld [vmem:[#allocation5 + $0x10] sm:$0xff] }
   0xe   :  { %64 = vst.msk [vmem:[#allocation2] sm:$0xff] %vm63_vm0, %v221_v0  ;;  %93 = vmatpush.msra.mxu0 %v73_v1  ;;  %129 = vmatpush.msra.mxu1 %v73_v1  ;;  %v71_v3 = vld [vmem:[#allocation5 + $0x8] sm:$0xff]  ;;  %v70_v4 = vld [vmem:[#allocation5] sm:$0xff]  ;;  %v68_v5 = vld [vmem:[#allocation3] sm:$0xff] }
   0xf   :  { %65 = vst.msk [vmem:[#allocation2 + $0x8] sm:$0xff] %vm63_vm0, %v221_v0  ;;  %v69_v6 = vld [vmem:[#allocation3 + $0x8] sm:$0xff]  ;;  %v139_v13 = vld [vmem:[#allocation7] ss:$0 sm:$0xff] }
  0x10   :  { %94 = vmatpush.msra.mxu0 %v72_v2  ;;  %130 = vmatpush.msra.mxu1 %v72_v2 }
  0x12   :  { %95 = vmatpush.msra.mxu0 %v71_v3  ;;  %131 = vmatpush.msra.mxu1 %v71_v3 }
  0x14   :  { %96 = vmatpush.msra.mxu0 %v70_v4  ;;  %132 = vmatpush.msra.mxu1 %v70_v4 }
  0x15   :  { %127 = vmatmul.msk.f32.vlgmr.msra.gmra.mxu0 %vm63_vm0, %v68_v5  ;;  %128 = vmatmul.msk.f32.vlgmr.msra.gmra.mxu1 %vm63_vm0, %v69_v6  ;;  %v66_v7 = vld [vmem:[#allocation2] sm:$0xff] }
  0x16   :  { %v67_v8 = vld [vmem:[#allocation2 + $0x8] sm:$0xff] }
  0x92   :  { %v98_v9 = vpop.f32.mrf.mxu0  ;;  %v101_v10 = vpop.f32.mrf.mxu1 }
  0x93   :  { %v104_v11 = vadd.f32 %v98_v9, %v66_v7  ;;  %v105_v12 = vadd.f32 %v101_v10, %v67_v8 }
  0x95   :  { %106 = vst.msk [vmem:[#allocation2] sm:$0xff] %vm63_vm0, %v104_v11 }
  0x96   :  { %107 = vst.msk [vmem:[#allocation2 + $0x8] sm:$0xff] %vm63_vm0, %v105_v12 }
  0x9c   :  { %v111_v14 = vld [vmem:[#allocation2] sm:$0xff] }
  0x9d   :  { %v117_v15 = vadd.f32 %v139_v13, %v111_v14  ;;  %v112_v16 = vld [vmem:[#allocation2 + $0x8] sm:$0xff] }
  0x9e   :  { %v118_v17 = vadd.f32 %v139_v13, %v112_v16 }
  0x9f   :  { %119 = vst.msk [vmem:[%s268_s3] sm:$0xff] %vm63_vm0, %v117_v15 }
  0xa0   :  { %120 = vst.msk [vmem:[%s268_s3 + $0x8] sm:$0xff] %vm63_vm0, %v118_v17 }
  0xa1   :  { %125 = vsyncpa [#allocation4], 1 }
  0xa2   :  { %126 = vsyncpa [#allocation6], 1 }

// kernel: multi_head_attention_forward.7
= control target key start
LH: loop header
LB: loop body
LE: loop exit
PB: predicated region body
PF: predicated region fallthrough
CT: control target
= control target key end

     0   :  { %12 = vsyncpa [#allocation3], 0  ;;  %s1340_s0 = inlined_call_operand.vmem [shape: f32[2,8,32], index: 0, kind: input, shape index: {}]   ;;  %s1341_s1 = inlined_call_operand.vmem [shape: f32[2,8,32], index: 1, kind: input, shape index: {}]   ;;  %s1342_s2 = inlined_call_operand.vmem [shape: f32[2,8,32], index: 2, kind: input, shape index: {}]   ;;  %s1343_s3 = inlined_call_operand.hbm [shape: f32[32,32], index: 3, kind: input, shape index: {}]   ;;  %s1344_s4 = inlined_call_operand.vmem [shape: f32[1,32], index: 4, kind: input, shape index: {}]   ;;  %s1345_s5 = inlined_call_operand.hbm [shape: f32[2,8,32], index: 5, kind: output, shape index: {0}]   ;;  %s1346_s6 = inlined_call_operand.hbm [shape: f32[2,4,8,8], index: 6, kind: output, shape index: {1}]  }
   0x1   :  { %13 = vsyncpa [#allocation4], 0 }
   0x2   :  { %15 = vsyncpa [#allocation4 + $0x1], 0 }
   0x3   :  { %16 = vsyncpa [#allocation7], 0 }
   0x4   :  { %18 = vsyncpa [#allocation7 + $0x1], 0  ;;  %s1166_s21 = smov 0   ;;  %s1168_s22 = smov 0  }
   0x5   :  { %s1170_s23 = smov 0   ;;  %s1172_s24 = smov 0  }
   0x6 LB: > { %s1187_s25 = sadd.s32 4294967295, %s1121_s24   ;;  %s876_s26 = sadd.s32 4294967294, %s1121_s24   ;;  %s1121_s24 = sphi %s1172_s24, %s1352_s24   ;;  %s1117_s23 = sphi %s1170_s23, %s1351_s23   ;;  %s1113_s22 = sphi %s1168_s22, %s1350_s22   ;;  %s1109_s21 = sphi %s1166_s21, %s1349_s21  }
   0x7   : > { %s1191_s27 = sadd.s32 1, %s1121_s24   ;;  %s151_s28 = sadd.s32 1, %s1117_s23 }
   0x8   : > { %s148_s29 = ssub.s32 %s1121_s24, %s1191_s27  ;;  %p161_p0 = scmp.ne.s32.totalorder %s1117_s23, %s1113_s22 }
   0x9   : > { %p149_p1 = scmp.eq.s32.totalorder %s148_s29, 0  ;;  %p162_p2 = scmp.eq.s32.totalorder %s1187_s25, 1 }
   0xa   : > { %p167_p3 = scmp.ne.s32.totalorder %s1113_s22, %s1109_s21  ;;  %p168_p4 = scmp.eq.s32.totalorder %s876_s26, 1 }
   0xb   : > { %s1202_s30 = scalar_select %p149_p1, %s1117_s23, %s151_s28  }
   0xc   : > { %p1204_p5 = por %p162_p2, %p161_p0  ;;  %p1208_p6 = por %p168_p4, %p167_p3 }
   0xd   : > { %p877_p7 = scmp.ge.s32.totalorder %s1121_s24, 1  ;;  %p201_p8 = scmp.lt.s32.totalorder %s1121_s24, 3 }
   0xe   : > { %p933_p9 = scmp.eq.s32.totalorder %s1187_s25, 0  ;;  %s212_s11 = sshll.u32 %s1343_s3, 4  ;;  %s213_s11 = int_to_ptr.hbm [resolvable:$true] %s212_s11 }
   0xf   : > { %p202_p10 = pnand %p877_p7, %p201_p8  ;;  %s1123_s12 = smov [#allocation2]  }
  0x10   : > { %s214_s13 = sshll.u32 %s1123_s12, 4  ;;  %s1124_s14 = smov 128   ;;  %s215_s13 = int_to_ptr.vmem [resolvable:$true] %s214_s13 }
  0x11   : > { %p922_p11 = pneg %p202_p10  ;;  %s1125_s15 = smov 8  }
  0x12   : > { %254 = sbr.rel (%p202_p10) target bundleno = 1219 (0x4c3), region = 40 }
  0x13   : > { %p923_p12 = pnand %p933_p9, %p922_p11 }
  0x15   : > { %925 = dma.hbm_to_vmem [thread:$0]  (!%p923_p12), %s213_s11, 512, %s215_s13, [#allocation3], %s1124_s14, %s1124_s14, %s1125_s15  }
  0x17   : > { %1096 = dma.done.wait (%p933_p9), [#allocation3], 512  }
  0x18   : > { %1098 = vsyncadd (%p933_p9), [#allocation3], 4294966784  ;;  %p297_p13 = scmp.lt.s32.totalorder %s1187_s25, 1  ;;  %vm312_vm0 = vcmask 64512   ;;  %s1126_s12 = smov 120   ;;  %v377_v35 = vld [vmem:[#allocation2] sm:$0xff] }
  0x19   : > { %s1127_s13 = smov 112   ;;  %s1128_s14 = smov 104   ;;  %v454_v52 = vld [vmem:[#allocation2 + $0x8] sm:$0xff]  ;;  %v577_v53 = vld [vmem:[#allocation2 + $0x10] sm:$0xff] }
  0x1a   : > { %s298_s16 = scalar_select %p297_p13, %s1187_s25, 1 }
  0x1b   : > { %s1259_s15 = sand.u32 1, %s1113_s22   ;;  %s913_s19 = sshll.u32 %s1187_s25, 5 }
  0x1c   : > { %s884_s17 = sshll.u32 %s298_s16, 3  ;;  %s883_s16 = sshll.u32 %s1259_s15, 5 }
  0x1d   : > { %s304_s20 = scalar_lea.vmem %s1341_s1, %s884_s17  ;;  %s300_s29 = scalar_lea.vmem %s1340_s0, %s884_s17 }
  0x1e   : > { %s308_s11 = scalar_lea.vmem %s1342_s2, %s884_s17  ;;  %v379_v0 = vld [vmem:[%s304_s20] sm:$0xff]  ;;  %s1264_s17 = scalar_lea.vmem [#allocation6], %s883_s16 }
  0x1f   : > { %385 = vrot.lane.b32.xlu0 %v379_v0, %s1126_s12  ;;  %887 = vmatpush.xpose.msk.msra.mxu0 %vm312_vm0, %v379_v0  ;;  %v1236_v1 = vld [vmem:[%s300_s29] sm:$0xff]  ;;  %s742_s18 = sshll.u32 %s1264_s17, 4  ;;  %s741_s28 = scalar_lea.hbm %s1346_s6, %s913_s19  ;;  %s743_s18 = int_to_ptr.vmem [resolvable:$true] %s742_s18 }
  0x20   : > { %v1238_v2 = vld [vmem:[%s308_s11] sm:$0xff]  ;;  %s744_s29 = sshll.u32 %s741_s28, 4  ;;  %s716_s9 = scalar_lea.sflag [#allocation7], %s1259_s15  ;;  %s745_s29 = int_to_ptr.hbm [resolvable:$true] %s744_s29 }
  0x21   : > { %372 = vmatpush.msra.mxu1 %v1238_v2  ;;  %s1037_s10 = sshra.s32 %s745_s29, 4  ;;  %s1038_s10 = int_to_ptr.hbm [resolvable:$true] %s1037_s10 }
  0x22   : > { %888 = vmatmul.msk.f32.vlgmr.msra.gmra.mxu0 %vm312_vm0, %v1236_v1  ;;  %s1039_s11 = scalar_lea.hbm %s1038_s10, 32  ;;  %p1044_p3 = scmp.lt.s32.totalorder %s1038_s10, %s1346_s6 }
  0x23   : > { %473 = vmatpush.msrb.mxu1 %v454_v52  ;;  %p1040_p0 = scmp.ne.s32.totalorder %s1038_s10, %s1039_s11 }
  0x25   : > { %p1041_p1 = pnand %p1040_p0, %p1204_p5 }
  0x27   : > { %382 = vrot.lane.b32.xlu0 %v1236_v1, %s1126_s12  ;;  %p1042_p2 = pneg %p1041_p1 }
  0x2f   : > { %428 = vrot.lane.b32.xlu0 %v1238_v2, %s1126_s12 }
  0x37   : > { %508 = vrot.lane.b32.xlu0 %v379_v0, %s1127_s13 }
  0x3f   : > { %505 = vrot.lane.b32.xlu0 %v1236_v1, %s1127_s13 }
  0x91   : > { %v386_v3 = vpop.permute.xlu0 %385 }
  0x92   : > { %890 = vmatpush.xpose.msk.msra.mxu2 %vm312_vm0, %v386_v3 }
  0x99   : > { %v383_v4 = vpop.permute.xlu0 %382 }
  0x9a   : > { %891 = vmatmul.msk.f32.vlgmr.msra.gmra.mxu2 %vm312_vm0, %v383_v4 }
  0x9f   : > { %v336_v5 = vpop.f32.mrf.mxu0 }
  0xa0   : > { %v339_v6 = vsel %vm312_vm0, %v336_v5, -inf }
  0xa1   : > { %v429_v7 = vpop.permute.xlu0 %428  ;;  %340 = vmax.xlane.f32.xlu1 %v339_v6 }
  0xa2   : > { %449 = vmatpush.msra.mxu3 %v429_v7 }
  0xa4   : > { %496 = vmatpush.msrb.mxu3 %v377_v35 }
  0xa9   : > { %v509_v8 = vpop.permute.xlu0 %508 }
  0xaa   : > { %896 = vmatpush.xpose.msk.msrb.mxu0 %vm312_vm0, %v509_v8 }
  0xb1   : > { %v506_v9 = vpop.permute.xlu0 %505 }
  0xb2   : > { %897 = vmatmul.msk.f32.vlgmr.msrb.gmra.mxu0 %vm312_vm0, %v506_v9 }
 0x114   : > { %v341_v10 = vpop.xlane.xlu1 %340 }
 0x115   : > { %v342_v11 = vsub.f32 %v336_v5, %v341_v10 }
 0x117   : > { %v343_v12 = vmul.f32 1.442695, %v342_v11 }
 0x119   : > { %977 = vpow2.f32 %v343_v12 }
 0x11d   : > { %v408_v13 = vpop.f32.mrf.mxu2 }
 0x11e   : > { %v411_v14 = vsel %vm312_vm0, %v408_v13, -inf }
 0x11f   : > { %v978_v15 = vpop.eup %977  ;;  %412 = vmax.xlane.f32.xlu2 %v411_v14 }
 0x120   : > { %v345_v16 = vsel %vm312_vm0, %v978_v15, 0.0 }
 0x121   : > { %346 = vadd.xlane.f32.xlu1 %v345_v16 }
 0x12f   : > { %v531_v17 = vpop.f32.mrf.mxu0 }
 0x130   : > { %v534_v18 = vsel %vm312_vm0, %v531_v17, -inf }
 0x131   : > { %535 = vmax.xlane.f32.xlu0 %v534_v18 }
 0x13a   : > { %609 = vrot.lane.b32.xlu1 %v379_v0, %s1128_s14 }
 0x145   : > { %551 = vrot.lane.b32.xlu0 %v1238_v2, %s1127_s13 }
 0x192   : > { %v413_v19 = vpop.xlane.xlu2 %412 }
 0x193   : > { %v414_v20 = vsub.f32 %v408_v13, %v413_v19 }
 0x194   : > { %v347_v21 = vpop.xlane.xlu1 %346 }
 0x195   : > { %v415_v22 = vmul.f32 1.442695, %v414_v20  ;;  %979 = vrcp.f32 %v347_v21 }
 0x197   : > { %981 = vpow2.f32 %v415_v22 }
 0x19b   : > { %v980_v23 = vpop.eup %979 }
 0x19c   : > { %v349_v24 = vmul.f32 %v980_v23, %v347_v21 }
 0x19d   : > { %v982_v25 = vpop.eup %981 }
 0x19e   : > { %v350_v26 = vsub.f32 2.0, %v349_v24  ;;  %v417_v27 = vsel %vm312_vm0, %v982_v25, 0.0 }
 0x19f   : > { %418 = vadd.xlane.f32.xlu2 %v417_v27 }
 0x1a0   : > { %v351_v28 = vmul.f32 %v980_v23, %v350_v26 }
 0x1a2   : > { %v352_v29 = vmul.f32 %v978_v15, %v351_v28 }
 0x1a4   : > { %v536_v30 = vpop.xlane.xlu0 %535  ;;  %889 = vmatmul.msk.f32.vlgmr.msra.gmra.mxu1 %vm312_vm0, %v352_v29  ;;  %353 = vst.msk [vmem:[%s1264_s17] sm:$0xff] %vm312_vm0, %v352_v29 }
 0x1a5   : > { %v537_v31 = vsub.f32 %v531_v17, %v536_v30  ;;  %596 = vmatpush.msra.mxu1 %v577_v53 }
 0x1a7   : > { %v538_v32 = vmul.f32 1.442695, %v537_v31 }
 0x1a9   : > { %983 = vpow2.f32 %v538_v32 }
 0x1ac   : > { %v610_v40 = vpop.permute.xlu1 %609 }
 0x1af   : > { %v984_v33 = vpop.eup %983 }
 0x1b0   : > { %v540_v34 = vsel %vm312_vm0, %v984_v33, 0.0 }
 0x1b1   : > { %541 = vadd.xlane.f32.xlu1 %v540_v34 }
 0x1b7   : > { %606 = vrot.lane.b32.xlu2 %v1236_v1, %s1128_s14  ;;  %v552_v37 = vpop.permute.xlu0 %551  ;;  %v678_v1 = vld [vmem:[#allocation2 + $0x18] sm:$0xff] }
 0x1b8   : > { %572 = vmatpush.msrb.mxu2 %v552_v37 }
 0x1ba   : > { %697 = vmatpush.msra.mxu2 %v678_v1 }
 0x1ca   : > { %652 = vrot.lane.b32.xlu1 %v1238_v2, %s1128_s14  ;;  %s1043_s14 = scalar_lea.hbm %s1346_s6, 64 }
 0x1cb   : > { %p1045_p4 = scmp.lt.s32.totalorder %s1043_s14, %s1039_s11 }
 0x1cd   : > { %p1046_p7 = por %p1045_p4, %p1044_p3 }
 0x1cf   : > { %p1047_p8 = pnand %p1046_p7, %p1042_p2 }
 0x212   : > { %v419_v36 = vpop.xlane.xlu2 %418 }
 0x213   : > { %985 = vrcp.f32 %v419_v36 }
 0x219   : > { %v986_v38 = vpop.eup %985 }
 0x21a   : > { %v421_v39 = vmul.f32 %v986_v38, %v419_v36  ;;  %v607_v49 = vpop.permute.xlu2 %606 }
 0x21c   : > { %v422_v41 = vsub.f32 2.0, %v421_v39 }
 0x21e   : > { %v423_v42 = vmul.f32 %v986_v38, %v422_v41 }
 0x220   : > { %v424_v43 = vmul.f32 %v982_v25, %v423_v42 }
 0x221   : > { %v374_v45 = vpop.f32.mrf.mxu1 }
 0x222   : > { %893 = vmatmul.msk.f32.vlgmr.msra.gmra.mxu3 %vm312_vm0, %v424_v43  ;;  %892 = vst.msk [vmem:[%s1264_s17 + $0x8] sm:$0xff] %vm312_vm0, %v424_v43 }
 0x223   : > { %901 = vmatpush.xpose.msk.msra.mxu3 %vm312_vm0, %v610_v40 }
 0x224   : > { %v542_v44 = vpop.xlane.xlu1 %541 }
 0x225   : > { %987 = vrcp.f32 %v542_v44 }
 0x22a   : > { %895 = vmatmul.msk.f32.vlgmr.msrb.gmra.mxu3 %vm312_vm0, %v374_v45 }
 0x22b   : > { %v988_v46 = vpop.eup %987 }
 0x22c   : > { %v544_v47 = vmul.f32 %v988_v46, %v542_v44 }
 0x22e   : > { %v545_v48 = vsub.f32 2.0, %v544_v47 }
 0x230   : > { %v546_v50 = vmul.f32 %v988_v46, %v545_v48 }
 0x232   : > { %v547_v51 = vmul.f32 %v984_v33, %v546_v50  ;;  %902 = vmatmul.msk.f32.vlgmr.msra.gmra.mxu3 %vm312_vm0, %v607_v49 }
 0x234   : > { %899 = vmatmul.msk.f32.vlgmr.msrb.gmra.mxu2 %vm312_vm0, %v547_v51  ;;  %898 = vst.msk [vmem:[%s1264_s17 + $0x10] sm:$0xff] %vm312_vm0, %v547_v51 }
 0x23c   : > { %v653_v0 = vpop.permute.xlu1 %652 }
 0x23d   : > { %673 = vmatpush.msra.mxu0 %v653_v0 }
 0x2a5   : > { %v451_v54 = vpop.f32.mrf.mxu3 }
 0x2a6   : > { %894 = vmatmul.msk.f32.vlgmr.msrb.gmra.mxu1 %vm312_vm0, %v451_v54 }
 0x2ad   : > { %v498_v55 = vpop.f32.mrf.mxu3 }
 0x2b5   : > { %v632_v56 = vpop.f32.mrf.mxu3 }
 0x2b6   : > { %v635_v57 = vsel %vm312_vm0, %v632_v56, -inf }
 0x2b7   : > { %636 = vmax.xlane.f32.xlu2 %v635_v57  ;;  %v574_v58 = vpop.f32.mrf.mxu2 }
 0x2b8   : > { %900 = vmatmul.msk.f32.vlgmr.msra.gmra.mxu1 %vm312_vm0, %v574_v58 }
 0x32a   : > { %v637_v59 = vpop.xlane.xlu2 %636 }
 0x32b   : > { %v638_v60 = vsub.f32 %v632_v56, %v637_v59 }
 0x32d   : > { %v639_v61 = vmul.f32 1.442695, %v638_v60 }
 0x32f   : > { %989 = vpow2.f32 %v639_v61 }
 0x335   : > { %v990_v62 = vpop.eup %989 }
 0x336   : > { %v641_v63 = vsel %vm312_vm0, %v990_v62, 0.0 }
 0x337   : > { %642 = vadd.xlane.f32.xlu2 %v641_v63 }
 0x3aa   : > { %v643_v2 = vpop.xlane.xlu2 %642 }
 0x3ab   : > { %991 = vrcp.f32 %v643_v2 }
 0x3b1   : > { %v992_v3 = vpop.eup %991 }
 0x3b2   : > { %v645_v4 = vmul.f32 %v992_v3, %v643_v2 }
 0x3b4   : > { %v646_v5 = vsub.f32 2.0, %v645_v4 }
 0x3b6   : > { %v647_v6 = vmul.f32 %v992_v3, %v646_v5 }
 0x3b8   : > { %v648_v7 = vmul.f32 %v990_v62, %v647_v6 }
 0x3ba   : > { %904 = vmatmul.msk.f32.vlgmr.msra.gmra.mxu0 %vm312_vm0, %v648_v7  ;;  %903 = vst.msk [vmem:[%s1264_s17 + $0x18] sm:$0xff] %vm312_vm0, %v648_v7 }
 0x437   : > { %v675_v8 = vpop.f32.mrf.mxu0 }
 0x438   : > { %905 = vmatmul.msk.f32.vlgmr.msra.gmra.mxu2 %vm312_vm0, %v675_v8 }
 0x439   : > { %1050 = shalt.err (!%p1047_p8)
}
 0x43a   : > { %s1129_s19 = smov 128   ;;  %s1130_s20 = smov 8   ;;  %v475_v9 = vpop.f32.mrf.mxu1  ;;  %v976_v13 = vld [vmem:[%s1344_s4] ss:$0 sm:$0xff]  ;;  %vm708_vm1 = vcmask 261120  }
 0x43b   : > { %919 = dma.vmem_to_hbm [thread:$0]  (%p1204_p5), %s743_s18, 512, %s745_s29, %s716_s9, %s1129_s19, %s1129_s19, %s1130_s20   ;;  %v499_v11 = vadd.f32 %v498_v55, %v475_v9 }
 0x43c   : > { %s882_s26 = sshll.u32 %s1259_s15, 3  ;;  %s908_s28 = sshll.u32 %s1187_s25, 3 }
 0x43d   : > { %s726_s10 = scalar_lea.hbm %s1345_s5, %s908_s28  ;;  %s289_s16 = scalar_lea.vmem [#allocation5], %s882_s26 }
 0x43e   : > { %s728_s17 = sshll.u32 %s289_s16, 4  ;;  %s730_s18 = sshll.u32 %s726_s10, 4  ;;  %s729_s17 = int_to_ptr.vmem [resolvable:$true] %s728_s17  ;;  %s731_s18 = int_to_ptr.hbm [resolvable:$true] %s730_s18 }
 0x43f   : > { %s711_s25 = scalar_lea.sflag [#allocation4], %s1259_s15  ;;  %s1065_s29 = sshra.s32 %s731_s18, 4  ;;  %s1066_s29 = int_to_ptr.hbm [resolvable:$true] %s1065_s29 }
 0x440   : > { %s1067_s9 = scalar_lea.hbm %s1066_s29, 8  ;;  %s1071_s26 = scalar_lea.hbm %s1345_s5, 16 }
 0x441   : > { %p1068_p9 = scmp.ne.s32.totalorder %s1066_s29, %s1067_s9  ;;  %p1072_p12 = scmp.lt.s32.totalorder %s1066_s29, %s1345_s5 }
 0x442   : > { %v598_v10 = vpop.f32.mrf.mxu1  ;;  %p1073_p13 = scmp.lt.s32.totalorder %s1071_s26, %s1067_s9 }
 0x443   : > { %v601_v12 = vadd.f32 %v598_v10, %v499_v11  ;;  %p1069_p10 = pnand %p1068_p9, %p1204_p5 }
 0x444   : > { %p1074_p0 = por %p1073_p13, %p1072_p12 }
 0x445   : > { %p1070_p11 = pneg %p1069_p10 }
 0x447   : > { %p1075_p1 = pnand %p1074_p0, %p1070_p11 }
 0x4bb   : > { %v699_v14 = vpop.f32.mrf.mxu2 }
 0x4bc   : > { %v702_v15 = vadd.f32 %v699_v14, %v601_v12 }
 0x4be   : > { %v707_v16 = vadd.f32 %v976_v13, %v702_v15 }
 0x4c0   : > { %709 = vst.msk [vmem:[%s289_s16] sm:$0xff] %vm708_vm1, %v707_v16 }
 0x4c1   : > { %1078 = shalt.err (!%p1075_p1)
}
 0x4c2   : > { %918 = dma.vmem_to_hbm [thread:$0]  (%p1204_p5), %s729_s17, 128, %s731_s18, %s711_s25  }
 0x4c3 PF: > { %p935_p2 = scmp.ge.s32.totalorder %s1121_s24, 2  ;;  %s759_s15 = sand.u32 1, %s1109_s21  }
 0x4c4   : > { %s760_s13 = scalar_lea.sflag [#allocation4], %s759_s15 }
 0x4c5   : > { %p927_p3 = pnand %p935_p2, %p1208_p6 }
 0x4c7   : > { %p928_p4 = pneg %p927_p3 }
 0x4c9   : > { %1100 = dma.done.wait (%p928_p4), %s760_s13, 128  }
 0x4ca   : > { %1102 = vsyncadd (%p928_p4), %s760_s13, 4294967168  ;;  %s770_s10 = scalar_lea.sflag [#allocation7], %s759_s15 }
 0x4cb   : > { %1104 = dma.done.wait (%p928_p4), %s770_s10, 512  }
 0x4cc   : > { %1106 = vsyncadd (%p928_p4), %s770_s10, 4294966784  ;;  %p21_p5 = scmp.ge.s32.totalorder %s1191_s27, 4   ;;  %s1349_s21 = smov %s1113_s22 }
 0x4cd   : > { %s1350_s22 = smov %s1117_s23  ;;  %s1351_s23 = smov %s1202_s30 }
 0x4ce   : > { %s1352_s24 = smov %s1191_s27  ;;  %23 = sbr.rel (!%p21_p5) target bundleno = 6 (0x6), region = 106 }
 0x4d3   :  { %776 = vsyncpa [#allocation3], 1 }
 0x4d4   :  { %778 = vsyncpa [#allocation3 + $0x1], 1 }
 0x4d5   :  { %779 = vsyncpa [#allocation4], 1 }
 0x4d6   :  { %781 = vsyncpa [#allocation4 + $0x1], 1 }
 0x4d7   :  { %782 = vsyncpa [#allocation7], 1 }
 0x4d8   :  { %784 = vsyncpa [#allocation7 + $0x1], 1 }

</bundles_post_ra>
